<compile_context>
chip_gen: v7x
topology: tpu7x:2x2x1
jax: 0.10.0
libtpu: 0.0.40
codegen_flags: <defaults>
</compile_context>

<pallas_src>
import functools

import jax
import jax.numpy as jnp
from jax.experimental import pallas as pl
from jax.experimental.pallas import tpu as pltpu


# ----------------------------------------------------------------------------
# Tiling helpers
# ----------------------------------------------------------------------------
def _round_up(x, m):
    return ((x + m - 1) // m) * m


def _k_tiling(K):
    """Pad K to a lane-friendly size; split into 512-wide tiles when large."""
    Kp = _round_up(K, 128)
    if Kp > 1536:
        Kp = _round_up(Kp, 512)
        tk = 512
    else:
        tk = Kp
    return Kp, tk


def _m_tiling(M):
    """Pad M (bf16 sublane granule = 16); tile at 256 rows when M allows it."""
    Mp = _round_up(M, 16)
    if Mp >= 256:
        Mp = _round_up(Mp, 256)
        tm = 256
    else:
        tm = Mp
    return Mp, tm


# ----------------------------------------------------------------------------
# Pallas kernels
# ----------------------------------------------------------------------------
def _gemm_kernel(a_ref, b_ref, bias_ref, o_ref, acc_ref, *, relu):
    k = pl.program_id(1)

    @pl.when(k == 0)
    def _():
        acc_ref[...] = jnp.zeros_like(acc_ref)

    acc_ref[...] += jnp.dot(a_ref[...], b_ref[...],
                            preferred_element_type=jnp.float32)

    @pl.when(k == pl.num_programs(1) - 1)
    def _():
        acc = acc_ref[...] + bias_ref[...]
        if relu:
            acc = jnp.maximum(acc, 0.0)
        o_ref[...] = acc.astype(o_ref.dtype)


def _gemm_res_kernel(a_ref, b_ref, bias_ref, r_ref, o_ref, acc_ref, *, relu):
    k = pl.program_id(1)

    @pl.when(k == 0)
    def _():
        acc_ref[...] = jnp.zeros_like(acc_ref)

    acc_ref[...] += jnp.dot(a_ref[...], b_ref[...],
                            preferred_element_type=jnp.float32)

    @pl.when(k == pl.num_programs(1) - 1)
    def _():
        acc = acc_ref[...] + bias_ref[...] + r_ref[...].astype(jnp.float32)
        if relu:
            acc = jnp.maximum(acc, 0.0)
        o_ref[...] = acc.astype(o_ref.dtype)


def _head_kernel(f_ref, w_ref, b_ref, o_ref):
    # Global average pool over the H*W axis, then the classifier matmul.
    f = jnp.mean(f_ref[...].astype(jnp.float32), axis=1)          # (N, C)
    o_ref[...] = (
        jnp.dot(f.astype(jnp.bfloat16), w_ref[...],
                preferred_element_type=jnp.float32)
        + b_ref[...]
    )


# ----------------------------------------------------------------------------
# Pallas wrappers
# ----------------------------------------------------------------------------
def pallas_gemm(a, b_padded, bias_padded, n_valid, residual=None, relu=False):
    """out = relu_opt(a @ b + bias (+ residual)).

    a:           (M, K)  bf16 (unpadded im2col patches)
    b_padded:    (Kp, Np) bf16, pre-padded weight matrix (built at init)
    bias_padded: (1, Np)  f32,  pre-padded folded-BN bias
    residual:    (M, n_valid) bf16 or None
    Returns (M, n_valid) bf16.
    """
    M, K = a.shape
    Kp, Np = b_padded.shape
    _, tk = _k_tiling(K)
    Mp, tm = _m_tiling(M)

    a_p = jnp.pad(a, ((0, Mp - M), (0, Kp - K)))
    grid = (Mp // tm, Kp // tk)

    in_specs = [
        pl.BlockSpec((tm, tk), lambda i, k: (i, k)),
        pl.BlockSpec((tk, Np), lambda i, k: (k, 0)),
        pl.BlockSpec((1, Np), lambda i, k: (0, 0)),
    ]
    args = [a_p, b_padded, bias_padded]
    if residual is not None:
        r_p = jnp.pad(residual, ((0, Mp - residual.shape[0]),
                                 (0, Np - residual.shape[1])))
        in_specs.append(pl.BlockSpec((tm, Np), lambda i, k: (i, 0)))
        args.append(r_p)
        kernel = functools.partial(_gemm_res_kernel, relu=relu)
    else:
        kernel = functools.partial(_gemm_kernel, relu=relu)

    bytes_accessed = (
        a_p.size * 2 + b_padded.size * 2 + Mp * Np * 2
        + (Mp * Np * 2 if residual is not None else 0)
        + bias_padded.size * 4
    )
    cost = pl.CostEstimate(flops=2 * Mp * Kp * Np, transcendentals=0,
                           bytes_accessed=bytes_accessed)

    out = pl.pallas_call(
        kernel,
        out_shape=jax.ShapeDtypeStruct((Mp, Np), jnp.bfloat16),
        grid=grid,
        in_specs=in_specs,
        out_specs=pl.BlockSpec((tm, Np), lambda i, k: (i, 0)),
        scratch_shapes=[pltpu.VMEM((tm, Np), jnp.float32)],
        compiler_params=pltpu.CompilerParams(
            dimension_semantics=("parallel", "arbitrary")),
        cost_estimate=cost,
    )(*args)
    return out[:M, :n_valid]


def pallas_avgpool_linear(feat, w_padded, b_padded, num_classes):
    """feat: (N, H*W, C) bf16 -> logits (N, num_classes) f32; avgpool + linear fused."""
    Nb, HW, C = feat.shape
    Np = w_padded.shape[1]
    cost = pl.CostEstimate(
        flops=2 * Nb * C * Np + Nb * HW * C, transcendentals=0,
        bytes_accessed=feat.size * 2 + w_padded.size * 2 + Nb * Np * 4)
    out = pl.pallas_call(
        _head_kernel,
        out_shape=jax.ShapeDtypeStruct((Nb, Np), jnp.float32),
        grid=(1,),
        in_specs=[
            pl.BlockSpec((Nb, HW, C), lambda i: (0, 0, 0)),
            pl.BlockSpec((C, Np), lambda i: (0, 0)),
            pl.BlockSpec((1, Np), lambda i: (0, 0)),
        ],
        out_specs=pl.BlockSpec((Nb, Np), lambda i: (0, 0)),
        cost_estimate=cost,
    )(feat, w_padded, b_padded)
    return out[:, :num_classes]


# ----------------------------------------------------------------------------
# Conv (im2col, NHWC) + folded-BN glue
# ----------------------------------------------------------------------------
def _im2col_nhwc(x, kh, kw, stride, pad):
    """x: NHWC -> patches (N*Hout*Wout, kh*kw*C), column order (ki, kj, c)."""
    N, H, W, C = x.shape
    if pad:
        x = jnp.pad(x, ((0, 0), (pad, pad), (pad, pad), (0, 0)))
    Hout = (H + 2 * pad - kh) // stride + 1
    Wout = (W + 2 * pad - kw) // stride + 1
    cols = [x[:, ki:ki + stride * Hout:stride, kj:kj + stride * Wout:stride, :]
            for ki in range(kh) for kj in range(kw)]
    patches = cols[0] if len(cols) == 1 else jnp.concatenate(cols, axis=-1)
    return patches.reshape(N * Hout * Wout, kh * kw * C), Hout, Wout


def conv_bn(x, p, relu, residual=None):
    """Conv2d(no bias) + folded BatchNorm (+ residual) + optional ReLU.  NHWC in/out."""
    N = x.shape[0]
    patches, Hout, Wout = _im2col_nhwc(x, p["kh"], p["kw"], p["stride"], p["pad"])
    res_mat = None
    if residual is not None:
        res_mat = residual.reshape(N * Hout * Wout, residual.shape[-1])
    out = pallas_gemm(patches, p["wmat"], p["bias"], p["cout"],
                      residual=res_mat, relu=relu)
    return out.reshape(N, Hout, Wout, p["cout"])


def maxpool_3x3_s2_p1(x):
    # nn.MaxPool2d(kernel_size=3, stride=2, padding=1), NHWC (lane-dense in C).
    return jax.lax.reduce_window(
        x, jnp.array(-jnp.inf, x.dtype), jax.lax.max,
        window_dimensions=(1, 3, 3, 1),
        window_strides=(1, 2, 2, 1),
        padding=((0, 0), (1, 1), (1, 1), (0, 0)),
    )


# ----------------------------------------------------------------------------
# ResNet-34 parameters (deterministic synthetic init; BN folded + weights
# pre-transposed / pre-padded / cast to bf16 at init)
# ----------------------------------------------------------------------------
def _fold_bn(key, cin, cout, k):
    k1, k2, k3, k4, k5 = jax.random.split(key, 5)
    w = jax.random.normal(k1, (cout, cin, k, k), jnp.float32) * jnp.sqrt(2.0 / (cin * k * k))
    gamma = jax.random.uniform(k2, (cout,), minval=0.5, maxval=1.5)
    beta = 0.1 * jax.random.normal(k3, (cout,))
    mean = 0.1 * jax.random.normal(k4, (cout,))
    var = jax.random.uniform(k5, (cout,), minval=0.5, maxval=1.5)
    scale = gamma / jnp.sqrt(var + 1e-5)
    return w * scale[:, None, None, None], beta - mean * scale


def _prep_conv(w, b, stride, pad):
    cout, cin, kh, kw = w.shape
    K = kh * kw * cin
    Kp, _ = _k_tiling(K)
    Np = _round_up(cout, 128)
    # (ki, kj, cin) row ordering matches _im2col_nhwc column ordering.
    wmat = w.transpose(2, 3, 1, 0).reshape(K, cout)
    wmat = jnp.pad(wmat, ((0, Kp - K), (0, Np - cout))).astype(jnp.bfloat16)
    bias = jnp.pad(b.reshape(1, -1), ((0, 0), (0, Np - cout))).astype(jnp.float32)
    return {"wmat": wmat, "bias": bias, "cout": cout,
            "kh": kh, "kw": kw, "stride": stride, "pad": pad}


def init_resnet34_params(key, num_classes):
    params = {"num_classes": num_classes}
    key, k = jax.random.split(key)
    w, b = _fold_bn(k, 3, 64, 7)
    params["conv1"] = _prep_conv(w, b, stride=2, pad=3)

    cfg = [(64, 3, 1), (128, 4, 2), (256, 6, 2), (512, 3, 2)]   # (out_ch, n_blocks, stride)
    in_c = 64
    layers = []
    for out_c, n_blocks, first_stride in cfg:
        blocks = []
        for bi in range(n_blocks):
            s = first_stride if bi == 0 else 1
            blk = {}
            key, k1 = jax.random.split(key)
            w1, b1 = _fold_bn(k1, in_c, out_c, 3)
            blk["conv1"] = _prep_conv(w1, b1, stride=s, pad=1)
            key, k2 = jax.random.split(key)
            w2, b2 = _fold_bn(k2, out_c, out_c, 3)
            blk["conv2"] = _prep_conv(w2, b2, stride=1, pad=1)
            if s != 1 or in_c != out_c:
                key, k3 = jax.random.split(key)
                wd, bd = _fold_bn(k3, in_c, out_c, 1)
                blk["down"] = _prep_conv(wd, bd, stride=s, pad=0)
            blocks.append(blk)
            in_c = out_c
        layers.append(blocks)
    params["layers"] = layers

    key, kf1, kf2 = jax.random.split(key, 3)
    lim = 1.0 / jnp.sqrt(512.0)
    ncls_p = _round_up(num_classes, 128)
    fc_w = jax.random.uniform(kf1, (512, num_classes), minval=-lim, maxval=lim)
    fc_b = jax.random.uniform(kf2, (num_classes,), minval=-lim, maxval=lim)
    params["fc_w"] = jnp.pad(fc_w, ((0, 0), (0, ncls_p - num_classes))).astype(jnp.bfloat16)
    params["fc_b"] = jnp.pad(fc_b.reshape(1, -1),
                             ((0, 0), (0, ncls_p - num_classes))).astype(jnp.float32)
    return params


# ----------------------------------------------------------------------------
# Forward pass (== PretrConvNet.forward == pretrained ResNet-34 w/ new head)
# ----------------------------------------------------------------------------
def basic_block(x, blk):
    identity = x
    out = conv_bn(x, blk["conv1"], relu=True)
    if "down" in blk:
        identity = conv_bn(x, blk["down"], relu=False)
    # conv2 + bn2 + residual add + relu, fused in the Pallas GEMM epilogue
    return conv_bn(out, blk["conv2"], relu=True, residual=identity)


def pretr_convnet_forward(x_nchw, params):
    # Single NCHW -> NHWC transpose + bf16 cast at the model boundary.
    x = x_nchw.transpose(0, 2, 3, 1).astype(jnp.bfloat16)
    x = conv_bn(x, params["conv1"], relu=True)
    x = maxpool_3x3_s2_p1(x)
    for layer in params["layers"]:
        for blk in layer:
            x = basic_block(x, blk)
    N, H, W, C = x.shape
    feat = x.reshape(N, H * W, C)                            # (N, H*W, C) bf16
    return pallas_avgpool_linear(feat, params["fc_w"], params["fc_b"],
                                 params["num_classes"])


# ----------------------------------------------------------------------------
if __name__ == "__main__":
    emotion_map = {"anger": 0, "disgust": 1, "fear": 2, "happy": 3,
                   "neutral": 4, "sad": 5, "surprise": 6}
    num_classes = len(emotion_map)

    key = jax.random.PRNGKey(0)
    kp, kx = jax.random.split(key)
    params = init_resnet34_params(kp, num_classes)

    # Small RGB images (ResNet-34 needs >=32px so layer4 output is non-empty).
    x = jax.random.normal(kx, (2, 3, 64, 64), jnp.float32)

    logits = pretr_convnet_forward(x, params)
    logits = jax.block_until_ready(logits)
    assert logits.shape == (2, num_classes), logits.shape
    assert logits.dtype == jnp.float32
    print("KERNEL_OK")
</pallas_src>

<mosaic_0001>
module attributes {stable_mosaic.version = 11 : i64} {
  func.func @_gemm_kernel(%arg0: i32, %arg1: i32, %arg2: memref<256x256xbf16, #tpu.memory_space<vmem>>, %arg3: memref<256x128xbf16, #tpu.memory_space<vmem>>, %arg4: memref<1x128xf32, #tpu.memory_space<vmem>>, %arg5: memref<256x128xbf16, #tpu.memory_space<vmem>>, %arg6: memref<256x128xf32, #tpu.memory_space<vmem>>) attributes {dimension_semantics = [#tpu.dimension_semantics<parallel>, #tpu.dimension_semantics<arbitrary>], iteration_bounds = array<i64: 8, 1>, scalar_prefetch = 0 : i64, scratch_operands = 1 : i64, tpu.core_type = #tpu.core_type<tc>, window_params = [{transform_indices = @transform_0, window_bounds = array<i64: 256, 256>}, {transform_indices = @transform_1, window_bounds = array<i64: 256, 128>}, {pipeline_mode = #tpu.pipeline_mode<synchronous>, transform_indices = @transform_2, window_bounds = array<i64: 1, 128>}, {transform_indices = @transform_3, window_bounds = array<i64: 256, 128>}]} {
    %c0_i32 = arith.constant 0 : i32
    %0 = arith.cmpi eq, %arg1, %c0_i32 : i32
    %1 = arith.extui %0 : i1 to i32
    %c0_i32_0 = arith.constant 0 : i32
    %2 = arith.cmpi ne, %1, %c0_i32_0 : i32
    scf.if %2 {
      %cst_10 = arith.constant 0.000000e+00 : f32
      %12 = vector.broadcast %cst_10 : f32 to vector<256x128xf32>
      %c0_11 = arith.constant 0 : index
      %c0_12 = arith.constant 0 : index
      %13 = vector.load %arg6[%c0_11, %c0_12] : memref<256x128xf32, #tpu.memory_space<vmem>>, vector<256x128xf32>
      tpu.vector_store %arg6[%c0_11, %c0_12], %12 {strides = array<i32>} : memref<256x128xf32, #tpu.memory_space<vmem>>, vector<256x128xf32>,
    } else {
    }
    %c0 = arith.constant 0 : index
    %c0_1 = arith.constant 0 : index
    %3 = vector.load %arg6[%c0, %c0_1] : memref<256x128xf32, #tpu.memory_space<vmem>>, vector<256x128xf32>
    %c0_2 = arith.constant 0 : index
    %c0_3 = arith.constant 0 : index
    %4 = vector.load %arg2[%c0_2, %c0_3] : memref<256x256xbf16, #tpu.memory_space<vmem>>, vector<256x256xbf16>
    %c0_4 = arith.constant 0 : index
    %c0_5 = arith.constant 0 : index
    %5 = vector.load %arg3[%c0_4, %c0_5] : memref<256x128xbf16, #tpu.memory_space<vmem>>, vector<256x128xbf16>
    %cst = arith.constant dense<0.000000e+00> : vector<256x128xf32>
    %6 = tpu.matmul %4, %5, %cst {dimension_numbers = #tpu.dot_dimension_numbers<[1], [0], [0], [1], [0, 0, 1, 1], [], []>} : vector<256x256xbf16>, vector<256x128xbf16>, vector<256x128xf32> -> vector<256x128xf32>
    %7 = arith.addf %3, %6 : vector<256x128xf32>
    %c0_6 = arith.constant 0 : index
    %c0_7 = arith.constant 0 : index
    %8 = vector.load %arg6[%c0_6, %c0_7] : memref<256x128xf32, #tpu.memory_space<vmem>>, vector<256x128xf32>
    tpu.vector_store %arg6[%c0_6, %c0_7], %7 {strides = array<i32>} : memref<256x128xf32, #tpu.memory_space<vmem>>, vector<256x128xf32>,
    %c0_i32_8 = arith.constant 0 : i32
    %9 = arith.cmpi eq, %arg1, %c0_i32_8 : i32
    %10 = arith.extui %9 : i1 to i32
    %c0_i32_9 = arith.constant 0 : i32
    %11 = arith.cmpi ne, %10, %c0_i32_9 : i32
    scf.if %11 {
      %c0_10 = arith.constant 0 : index
      %c0_11 = arith.constant 0 : index
      %12 = vector.load %arg6[%c0_10, %c0_11] : memref<256x128xf32, #tpu.memory_space<vmem>>, vector<256x128xf32>
      %c0_12 = arith.constant 0 : index
      %c0_13 = arith.constant 0 : index
      %13 = vector.load %arg4[%c0_12, %c0_13] : memref<1x128xf32, #tpu.memory_space<vmem>>, vector<1x128xf32>
      %14 = vector.broadcast %13 : vector<1x128xf32> to vector<256x128xf32>
      %15 = arith.addf %12, %14 : vector<256x128xf32>
      %cst_14 = arith.constant 0.000000e+00 : f32
      %16 = vector.broadcast %cst_14 : f32 to vector<256x128xf32>
      %17 = arith.maximumf %15, %16 : vector<256x128xf32>
      %18 = arith.truncf %17 : vector<256x128xf32> to vector<256x128xbf16>
      %c0_15 = arith.constant 0 : index
      %c0_16 = arith.constant 0 : index
      %19 = vector.load %arg5[%c0_15, %c0_16] : memref<256x128xbf16, #tpu.memory_space<vmem>>, vector<256x128xbf16>
      tpu.vector_store %arg5[%c0_15, %c0_16], %18 {strides = array<i32>} : memref<256x128xbf16, #tpu.memory_space<vmem>>, vector<256x128xbf16>,
    } else {
    }
    return
  }
  func.func @transform_0(%arg0: i32, %arg1: i32) -> (i32, i32) {
    %c0_i32 = arith.constant 0 : i32
    return %arg0, %arg1 : i32, i32
  }
  func.func @transform_1(%arg0: i32, %arg1: i32) -> (i32, i32) {
    %c0_i32 = arith.constant 0 : i32
    %c0_i32_0 = arith.constant 0 : i32
    return %arg1, %c0_i32 : i32, i32
  }
  func.func @transform_2(%arg0: i32, %arg1: i32) -> (i32, i32) {
    %c0_i32 = arith.constant 0 : i32
    %c0_i32_0 = arith.constant 0 : i32
    %c0_i32_1 = arith.constant 0 : i32
    return %c0_i32, %c0_i32_0 : i32, i32
  }
  func.func @transform_3(%arg0: i32, %arg1: i32) -> (i32, i32) {
    %c0_i32 = arith.constant 0 : i32
    %c0_i32_0 = arith.constant 0 : i32
    return %arg0, %c0_i32 : i32, i32
  }
}

</mosaic_0001>

<bundles_post_ra>
// kernel: tpu_custom_call.1
= control target key start
LH: loop header
LB: loop body
LE: loop exit
PB: predicated region body
PF: predicated region fallthrough
CT: control target
= control target key end

     0   :  { %8 = vsyncpa [#allocation4], 0  ;;  %s2206_s0 = inlined_call_operand.hbm [shape: bf16[2048,256], index: 0, kind: input, shape index: {}]   ;;  %s2207_s1 = inlined_call_operand.hbm [shape: bf16[256,128], index: 1, kind: input, shape index: {}]   ;;  %s2208_s2 = inlined_call_operand.vmem [shape: f32[1,128], index: 2, kind: input, shape index: {}]   ;;  %s2209_s3 = inlined_call_operand.hbm [shape: bf16[2048,128], index: 3, kind: output, shape index: {}]  }
   0x1   :  { %10 = vsyncpa [#allocation4 + $0x1], 0 }
   0x2   :  { %11 = vsyncpa [#allocation7], 0 }
   0x3   :  { %12 = vsyncpa [#allocation5], 0 }
   0x4   :  { %14 = vsyncpa [#allocation5 + $0x1], 0  ;;  %s1898_s12 = smov 0   ;;  %s1900_s13 = smov 0  }
   0x5   :  { %s1902_s14 = smov 0   ;;  %s1904_s15 = smov 0  }
   0x6   :  { %s1906_s16 = smov 0   ;;  %s1908_s17 = smov 0  }
   0x7 LB: > { %s1223_s18 = sadd.s32 4294967295, %s1867_s17   ;;  %s1224_s19 = sadd.s32 4294967294, %s1867_s17   ;;  %s1867_s17 = sphi %s1908_s17, %s20_s17   ;;  %s1863_s16 = sphi %s1906_s16, %s2232_s16   ;;  %s1859_s15 = sphi %s1904_s15, %s2231_s15   ;;  %s1855_s14 = sphi %s1902_s14, %s2230_s14   ;;  %s1851_s13 = sphi %s1900_s13, %s2229_s13   ;;  %s1847_s12 = sphi %s1898_s12, %s2228_s12  }
   0x8   : > { %p54_p0 = scmp.ne.s32.totalorder %s1851_s13, %s1847_s12  ;;  %p1932_p1 = scmp.eq.s32.totalorder %s1223_s18, 0 }
   0x9   : > { %p1936_p2 = scmp.eq.s32.totalorder %s1223_s18, 7  ;;  %p131_p3 = scmp.eq.s32.totalorder %s1224_s19, 7 }
   0xa   : > { %s2214_s20 = scalar_select %p1932_p1, 1, 0 }
   0xb   : > { %s2215_s21 = scalar_select %p1936_p2, 1, 0 }
   0xc   : > { %p1942_p4 = por %p1932_p1, %p54_p0  ;;  %p1225_p5 = scmp.ge.s32.totalorder %s1867_s17, 1 }
   0xd   : > { %p1947_p6 = por %p131_p3, %p54_p0  ;;  %p138_p7 = scmp.lt.s32.totalorder %s1867_s17, 9 }
   0xe   : > { %s2216_s22 = scalar_select %p1942_p4, 1, 0 }
   0xf   : > { %s2217_s23 = scalar_select %p1947_p6, 1, 0 }
  0x10   : > { %p1952_p8 = pnand %p1225_p5, %p138_p7  ;;  %s1869_s25 = smov [#allocation6]  }
  0x11   : > { %s153_s26 = sshll.u32 %s1869_s25, 4  ;;  %s32_s28 = sadd.s32 1, %s1863_s16  ;;  %s154_s26 = int_to_ptr.vmem [resolvable:$true] %s153_s26 }
  0x12   : > { %s2218_s24 = scalar_select %p1952_p8, 1, 0 }
  0x13   : > { %p1588_p9 = pneg %p1952_p8  ;;  %s1723_s4 = scalar_lea.hbm %s2207_s1, 2048 }
  0x14   : > { %p1724_p11 = scmp.ne.s32.totalorder %s2207_s1, %s1723_s4  ;;  %p1730_p3 = scmp.lt.u32.totalorder %s1723_s4, %s2207_s1 }
  0x15   : > { %p1960_p10 = pnand %p1588_p9, %p1932_p1 }
  0x17   : > { %p1725_p12 = pneg %p1960_p10 }
  0x19   : > { %p1726_p13 = pnand %p1725_p12, %p1724_p11 }
  0x1b   : > { %p1727_p0 = pneg %p1726_p13 }
  0x1d   : > { %p1732_p5 = pnand %p1730_p3, %p1727_p0 }
  0x1f   : > { %1735 = shalt.err (!%p1732_p5)
}
  0x20   : > { %s1736_s9 = scalar_lea.vmem %s154_s26, 2048  ;;  %p1744_p1 = scmp.lt.s32.totalorder %s154_s26, %s154_s26 }
  0x21   : > { %p1737_p7 = scmp.ne.s32.totalorder %s154_s26, %s1736_s9  ;;  %p1745_p4 = scmp.lt.s32.totalorder %s1736_s9, %s1736_s9 }
  0x23   : > { %p1739_p9 = pnand %p1737_p7, %p1725_p12  ;;  %p1746_p8 = por %p1745_p4, %p1744_p1 }
  0x25   : > { %p1740_p6 = pneg %p1739_p9 }
  0x27   : > { %p1747_p2 = pnand %p1746_p8, %p1740_p6 }
  0x29   : > { %1750 = shalt.err (!%p1747_p2)
}
  0x2a   : > { %s1870_s10 = smov 64   ;;  %s1871_s11 = smov 4  }
  0x2b   : > { %1591 = dma.hbm_to_vmem [thread:$0]  (!%p1960_p10), %s2207_s1, 2048, %s154_s26, [#allocation7], %s1870_s10, %s1870_s10, %s1871_s11  }
  0x2c   : > { %p34_p1 = scmp.ge.s32.totalorder %s32_s28, 8  ;;  %s41_s25 = sadd.s32 1, %s1855_s14 }
  0x2d   : > { %p48_p2 = scmp.ne.s32.totalorder %s1855_s14, %s1851_s13  ;;  %p49_p4 = scmp.eq.s32.totalorder %s1867_s17, 0 }
  0x2e   : > { %s2234_s28 = smov (%p34_p1, %s32_s28), 0  ;;  %p2221_p8 = scmp.ne.s32.totalorder %s2215_s21, 0 }
  0x2f   : > { %p1987_p6 = por %p49_p4, %p48_p2  ;;  %s36_s27 = ssub.s32 %s1863_s16, %s2234_s28 }
  0x30   : > { %p1993_p11 = por %p2221_p8, %p48_p2  ;;  %p1601_p12 = scmp.lt.s32.totalorder %s1867_s17, 8 }
  0x31   : > { %p39_p10 = scmp.eq.s32.totalorder %s36_s27, 0  ;;  %s170_s26 = sand.u32 1, %s1855_s14  }
  0x32   : > { %s1228_s4 = sshll.u32 %s170_s26, 8  ;;  %s1323_s6 = sshll.u32 %s1863_s16, 12 }
  0x33   : > { %s2002_s5 = scalar_select %p39_p10, %s1855_s14, %s41_s25  }
  0x34   : > { %s2008_s9 = scalar_lea.hbm %s2206_s0, %s1323_s6  ;;  %s174_s21 = scalar_lea.vmem [#allocation3], %s1228_s4 }
  0x35   : > { %s184_s10 = sshll.u32 %s174_s21, 4  ;;  %p2014_p13 = pnand %p1601_p12, %p1987_p6  ;;  %s2010_s10 = int_to_ptr.vmem [resolvable:$true] %s184_s10 }
  0x36   : > { %s2018_s18 = scalar_lea.sflag [#allocation4], %s170_s26  ;;  %s1751_s19 = scalar_lea.hbm %s2008_s9, 4096 }
  0x37   : > { %p1752_p0 = scmp.ne.s32.totalorder %s2008_s9, %s1751_s19  ;;  %p1753_p3 = pneg %p2014_p13 }
  0x38   : > { %s1756_s29 = scalar_lea.hbm %s2206_s0, 32768  ;;  %p1757_p9 = scmp.lt.u32.totalorder %s2008_s9, %s2206_s0 }
  0x39   : > { %p1754_p5 = pnand %p1753_p3, %p1752_p0  ;;  %p1758_p1 = scmp.lt.u32.totalorder %s1756_s29, %s1751_s19 }
  0x3a   : > { %p1760_p4 = scmp.lt.u32.totalorder %s1751_s19, %s2008_s9 }
  0x3b   : > { %p1755_p7 = pneg %p1754_p5  ;;  %p1759_p2 = por %p1758_p1, %p1757_p9 }
  0x3d   : > { %p1761_p6 = por %p1760_p4, %p1759_p2 }
  0x3f   : > { %p1762_p8 = pnand %p1761_p6, %p1755_p7 }
  0x41   : > { %1765 = shalt.err (!%p1762_p8)
}
  0x42   : > { %s1766_s26 = scalar_lea.vmem %s2010_s10, 4096  ;;  %s1872_s7 = smov [#allocation3]  }
  0x43   : > { %p1767_p12 = scmp.ne.s32.totalorder %s2010_s10, %s1766_s26  ;;  %s1771_s8 = sshll.u32 %s1872_s7, 4  ;;  %s1772_s8 = int_to_ptr.vmem [resolvable:$false] %s1771_s8 }
  0x44   : > { %s1773_s21 = scalar_lea.vmem %s1772_s8, 8192  ;;  %p1774_p5 = scmp.lt.s32.totalorder %s2010_s10, %s1772_s8 }
  0x45   : > { %p1769_p10 = pnand %p1767_p12, %p1753_p3  ;;  %p1775_p9 = scmp.lt.s32.totalorder %s1773_s21, %s1766_s26 }
  0x47   : > { %p1770_p0 = pneg %p1769_p10  ;;  %p1776_p1 = por %p1775_p9, %p1774_p5 }
  0x49   : > { %p1777_p2 = pnand %p1776_p1, %p1770_p0 }
  0x4b   : > { %1780 = shalt.err (!%p1777_p2)
}
  0x4c   : > { %s1873_s19 = smov 128   ;;  %s1874_s25 = smov 8  }
  0x4d   : > { %1595 = dma.hbm_to_vmem [thread:$0]  (!%p2014_p13), %s2008_s9, 4096, %s2010_s10, %s2018_s18, %s1873_s19, %s1873_s19, %s1874_s25  }
  0x4e   : > { %p2224_p3 = scmp.ne.s32.totalorder %s2218_s24, 0 }
  0x4f   : > { %s2049_s27 = sand.u32 (!%p2224_p3), 1, %s1851_s13   ;;  %p2225_p7 = scmp.ne.s32.totalorder (!%p2224_p3), %s2216_s22, 0 }
  0x50   : > { %196 = sbr.rel (%p2224_p3) target bundleno = 419 (0x1a3), region = 32  ;;  %s1233_s29 = sshll.u32 (!%p2224_p3), %s2049_s27, 8 }
  0x51   : > { %s199_s4 = scalar_lea.sflag (!%p2224_p3), [#allocation4], %s2049_s27  ;;  %s2053_s6 = scalar_lea.vmem (!%p2224_p3), [#allocation3], %s1233_s29 }
  0x57   : > { %1834 = dma.done.wait (%p2225_p7), %s199_s4, 4096  }
  0x58   : > { %1836 = vsyncadd (%p2225_p7), %s199_s4, 4294963200  ;;  %p2226_p13 = scmp.ne.s32.totalorder %s2214_s20, 0 }
  0x5a   : > { %1838 = dma.done.wait (%p2226_p13), [#allocation7], 2048  }
  0x5b   : > { %1840 = vsyncadd (%p2226_p13), [#allocation7], 4294965248  ;;  %v1659_v0 = vld [vmem:[#allocation6 + $0x40] sm:$0xff]   ;;  %v1661_v2 = vld [vmem:[#allocation6 + $0x48] sm:$0xff]   ;;  %s1235_s24 = sshll.u32 %s2049_s27, 7  ;;  %s1356_s10 = sshll.u32 %s1859_s15, 11 }
  0x5c   : > { %v1660_v1 = vld [vmem:[#allocation6] sm:$0xff]   ;;  %1452 = vmatprep.subr.bf16.mxu0 %v1659_v0  ;;  %1564 = vmatprep.subr.bf16.mxu1 %v1659_v0  ;;  %v1662_v3 = vld [vmem:[#allocation6 + $0x8] sm:$0xff]   ;;  %v1663_v4 = vld [vmem:[#allocation6 + $0x50] sm:$0xff]   ;;  %s2105_s9 = scalar_lea.vmem [#allocation8], %s1235_s24  ;;  %s2154_s7 = scalar_lea.hbm %s2209_s3, %s1356_s10 }
  0x5d   : > { %1453 = vmatpush3.bf16.msra.mxu0 %v1660_v1  ;;  %1572 = vmatpush3.bf16.msra.mxu1 %v1660_v1  ;;  %v1664_v5 = vld [vmem:[#allocation6 + $0x10] sm:$0xff]   ;;  %v1665_v6 = vld [vmem:[#allocation6 + $0x58] sm:$0xff]   ;;  %v1667_v8 = vld [vmem:[#allocation6 + $0x60] sm:$0xff]   ;;  %s1127_s11 = sshll.u32 %s2105_s9, 4  ;;  %s1114_s15 = scalar_lea.sflag [#allocation5], %s2049_s27  ;;  %s2156_s11 = int_to_ptr.vmem [resolvable:$true] %s1127_s11 }
  0x5e   : > { %1454 = vmatprep.subr.bf16.mxu0 %v1661_v2  ;;  %1565 = vmatprep.subr.bf16.mxu1 %v1661_v2  ;;  %v1666_v7 = vld [vmem:[#allocation6 + $0x18] sm:$0xff]   ;;  %v1668_v9 = vld [vmem:[#allocation6 + $0x20] sm:$0xff]   ;;  %v1669_v10 = vld [vmem:[#allocation6 + $0x68] sm:$0xff]   ;;  %s1781_s8 = scalar_lea.vmem %s2156_s11, 2048  ;;  %s1875_s21 = smov [#allocation8]  }
  0x5f   : > { %v1677_v11 = vld [vmem:[%s2053_s6 + $0x4] ss:$8 sps:$4 sm:$0xff]   ;;  %v1671_v14 = vld [vmem:[#allocation6 + $0x70] sm:$0xff]   ;;  %v1673_v16 = vld [vmem:[#allocation6 + $0x78] sm:$0xff]   ;;  %p1782_p4 = scmp.ne.s32.totalorder %s2156_s11, %s1781_s8  ;;  %s1785_s19 = sshll.u32 %s1875_s21, 4  ;;  %s1786_s19 = int_to_ptr.vmem [resolvable:$false] %s1785_s19 }
  0x60   : > { %v1680_v12 = vld [vmem:[%s2053_s6 + $0x84] ss:$8 sps:$4 sm:$0xff]   ;;  %654 = vmatprep.mubr.bf16.mxu0 %v1677_v11  ;;  %v1672_v15 = vld [vmem:[#allocation6 + $0x30] sm:$0xff]   ;;  %v1674_v17 = vld [vmem:[#allocation6 + $0x38] sm:$0xff]   ;;  %s1787_s25 = scalar_lea.vmem %s1786_s19, 4096  ;;  %p1788_p12 = scmp.lt.s32.totalorder %s2156_s11, %s1786_s19 }
  0x61   : > { %1455 = vmatpush3.bf16.msra.mxu0 %v1662_v3  ;;  %1573 = vmatpush3.bf16.msra.mxu1 %v1662_v3  ;;  %v1670_v13 = vld [vmem:[#allocation6 + $0x28] sm:$0xff]   ;;  %v1681_v20 = vld [vmem:[%s2053_s6 + $0x14] ss:$8 sps:$4 sm:$0xff]   ;;  %v1685_v22 = vld [vmem:[%s2053_s6 + $0x10] ss:$8 sps:$4 sm:$0xff]   ;;  %p1783_p6 = pnand %p1782_p4, %p1993_p11  ;;  %p1789_p10 = scmp.lt.s32.totalorder %s1787_s25, %s1781_s8 }
  0x62   : > { %1456 = vmatprep.subr.bf16.mxu0 %v1663_v4  ;;  %1566 = vmatprep.subr.bf16.mxu1 %v1663_v4  ;;  %v1675_v18 = vld [vmem:[%s2053_s6] ss:$8 sps:$4 sm:$0xff]   ;;  %v1683_v21 = vld [vmem:[%s2053_s6 + $0x94] ss:$8 sps:$4 sm:$0xff]   ;;  %v1686_v23 = vld [vmem:[%s2053_s6 + $0x90] ss:$8 sps:$4 sm:$0xff]  }
  0x63   : > { %718 = vmatprep.mubr.bf16.mxu1 %v1680_v12  ;;  %v1678_v19 = vld [vmem:[%s2053_s6 + $0x80] ss:$8 sps:$4 sm:$0xff]   ;;  %v1687_v24 = vld [vmem:[%s2053_s6 + $0x24] ss:$8 sps:$4 sm:$0xff]   ;;  %v1693_v28 = vld [vmem:[%s2053_s6 + $0x34] ss:$8 sps:$4 sm:$0xff]   ;;  %p1784_p8 = pneg %p1783_p6  ;;  %p1790_p0 = por %p1789_p10, %p1788_p12 }
  0x64   : > { %v1689_v25 = vld [vmem:[%s2053_s6 + $0xa4] ss:$8 sps:$4 sm:$0xff]   ;;  %v1691_v26 = vld [vmem:[%s2053_s6 + $0x20] ss:$8 sps:$4 sm:$0xff]   ;;  %v1695_v29 = vld [vmem:[%s2053_s6 + $0xb4] ss:$8 sps:$4 sm:$0xff]  }
  0x65   : > { %1457 = vmatpush3.bf16.msra.mxu0 %v1664_v5  ;;  %1574 = vmatpush3.bf16.msra.mxu1 %v1664_v5  ;;  %v1692_v27 = vld [vmem:[%s2053_s6 + $0xa0] ss:$8 sps:$4 sm:$0xff]   ;;  %v1697_v30 = vld [vmem:[%s2053_s6 + $0x30] ss:$8 sps:$4 sm:$0xff]   ;;  %v1699_v32 = vld [vmem:[%s2053_s6 + $0x44] ss:$8 sps:$4 sm:$0xff]   ;;  %p1791_p5 = pnand %p1790_p0, %p1784_p8 }
  0x66   : > { %1458 = vmatprep.subr.bf16.mxu0 %v1665_v6  ;;  %1567 = vmatprep.subr.bf16.mxu1 %v1665_v6  ;;  %v1698_v31 = vld [vmem:[%s2053_s6 + $0xb0] ss:$8 sps:$4 sm:$0xff]   ;;  %v1701_v33 = vld [vmem:[%s2053_s6 + $0xc4] ss:$8 sps:$4 sm:$0xff]   ;;  %v1703_v34 = vld [vmem:[%s2053_s6 + $0x40] ss:$8 sps:$4 sm:$0xff]  }
  0x67   : > { %v1704_v35 = vld [vmem:[%s2053_s6 + $0xc0] ss:$8 sps:$4 sm:$0xff]   ;;  %v1705_v36 = vld [vmem:[%s2053_s6 + $0x54] ss:$8 sps:$4 sm:$0xff]   ;;  %v1709_v38 = vld [vmem:[%s2053_s6 + $0x50] ss:$8 sps:$4 sm:$0xff]  }
  0x68   : > { %v1707_v37 = vld [vmem:[%s2053_s6 + $0xd4] ss:$8 sps:$4 sm:$0xff]   ;;  %v1710_v39 = vld [vmem:[%s2053_s6 + $0xd0] ss:$8 sps:$4 sm:$0xff]   ;;  %v1711_v40 = vld [vmem:[%s2053_s6 + $0x64] ss:$8 sps:$4 sm:$0xff]  }
  0x69   : > { %1459 = vmatpush3.bf16.msra.mxu0 %v1666_v7  ;;  %1575 = vmatpush3.bf16.msra.mxu1 %v1666_v7  ;;  %v1713_v41 = vld [vmem:[%s2053_s6 + $0xe4] ss:$8 sps:$4 sm:$0xff]   ;;  %v1715_v42 = vld [vmem:[%s2053_s6 + $0x60] ss:$8 sps:$4 sm:$0xff]   ;;  %v1717_v44 = vld [vmem:[%s2053_s6 + $0x74] ss:$8 sps:$4 sm:$0xff]  }
  0x6a   : > { %1460 = vmatprep.subr.bf16.mxu0 %v1667_v8  ;;  %1568 = vmatprep.subr.bf16.mxu1 %v1667_v8  ;;  %v1716_v43 = vld [vmem:[%s2053_s6 + $0xe0] ss:$8 sps:$4 sm:$0xff]   ;;  %v1719_v45 = vld [vmem:[%s2053_s6 + $0xf4] ss:$8 sps:$4 sm:$0xff]   ;;  %v1721_v46 = vld [vmem:[%s2053_s6 + $0x70] ss:$8 sps:$4 sm:$0xff]  }
  0x6b   : > { %v1722_v47 = vld [vmem:[%s2053_s6 + $0xf0] ss:$8 sps:$4 sm:$0xff]   ;;  %v2098_v51 = vld [vmem:[%s2208_s2] ss:$0 sm:$0xff] }
  0x6d   : > { %1461 = vmatpush3.bf16.msra.mxu0 %v1668_v9  ;;  %1576 = vmatpush3.bf16.msra.mxu1 %v1668_v9 }
  0x6e   : > { %1462 = vmatprep.subr.bf16.mxu0 %v1669_v10  ;;  %1569 = vmatprep.subr.bf16.mxu1 %v1669_v10 }
  0x71   : > { %1463 = vmatpush3.bf16.msra.mxu0 %v1670_v13  ;;  %1577 = vmatpush3.bf16.msra.mxu1 %v1670_v13 }
  0x72   : > { %1464 = vmatprep.subr.bf16.mxu0 %v1671_v14  ;;  %1570 = vmatprep.subr.bf16.mxu1 %v1671_v14 }
  0x75   : > { %1465 = vmatpush3.bf16.msra.mxu0 %v1672_v15  ;;  %1578 = vmatpush3.bf16.msra.mxu1 %v1672_v15 }
  0x76   : > { %1466 = vmatprep.subr.bf16.mxu0 %v1673_v16  ;;  %1571 = vmatprep.subr.bf16.mxu1 %v1673_v16 }
  0x79   : > { %1467 = vmatpush3.bf16.msra.mxu0 %v1674_v17  ;;  %1579 = vmatpush3.bf16.msra.mxu1 %v1674_v17 }
  0x7c   : > { %655 = vmatmul.mubr.bf16.vlgmr.msra.gmra.mrb[0].mxu0 %v1675_v18  ;;  %719 = vmatmul.mubr.bf16.vlgmr.msra.gmra.mrb[0].mxu1 %v1678_v19 }
  0x7d   : > { %662 = vmatprep.mubr.bf16.mxu0 %v1681_v20  ;;  %726 = vmatprep.mubr.bf16.mxu1 %v1683_v21 }
  0x84   : > { %663 = vmatmul.mubr.bf16.gmra.mrb[4].mxu0 %v1685_v22  ;;  %727 = vmatmul.mubr.bf16.gmra.mrb[4].mxu1 %v1686_v23 }
  0x85   : > { %670 = vmatprep.mubr.bf16.mxu0 %v1687_v24  ;;  %734 = vmatprep.mubr.bf16.mxu1 %v1689_v25 }
  0x8c   : > { %671 = vmatmul.mubr.bf16.gmra.mrb[8].mxu0 %v1691_v26  ;;  %735 = vmatmul.mubr.bf16.gmra.mrb[8].mxu1 %v1692_v27 }
  0x8d   : > { %678 = vmatprep.mubr.bf16.mxu0 %v1693_v28  ;;  %742 = vmatprep.mubr.bf16.mxu1 %v1695_v29 }
  0x94   : > { %679 = vmatmul.mubr.bf16.gmra.mrb[12].mxu0 %v1697_v30  ;;  %743 = vmatmul.mubr.bf16.gmra.mrb[12].mxu1 %v1698_v31 }
  0x95   : > { %686 = vmatprep.mubr.bf16.mxu0 %v1699_v32  ;;  %750 = vmatprep.mubr.bf16.mxu1 %v1701_v33 }
  0x9c   : > { %687 = vmatmul.mubr.bf16.gmra.mrb[16].mxu0 %v1703_v34  ;;  %751 = vmatmul.mubr.bf16.gmra.mrb[16].mxu1 %v1704_v35 }
  0x9d   : > { %694 = vmatprep.mubr.bf16.mxu0 %v1705_v36  ;;  %758 = vmatprep.mubr.bf16.mxu1 %v1707_v37 }
  0xa4   : > { %695 = vmatmul.mubr.bf16.gmra.mrb[20].mxu0 %v1709_v38  ;;  %759 = vmatmul.mubr.bf16.gmra.mrb[20].mxu1 %v1710_v39 }
  0xa5   : > { %702 = vmatprep.mubr.bf16.mxu0 %v1711_v40  ;;  %766 = vmatprep.mubr.bf16.mxu1 %v1713_v41 }
  0xac   : > { %703 = vmatmul.mubr.bf16.gmra.mrb[24].mxu0 %v1715_v42  ;;  %767 = vmatmul.mubr.bf16.gmra.mrb[24].mxu1 %v1716_v43 }
  0xad   : > { %710 = vmatprep.mubr.bf16.mxu0 %v1717_v44  ;;  %774 = vmatprep.mubr.bf16.mxu1 %v1719_v45 }
  0xb4   : > { %711 = vmatmul.mubr.bf16.gmra.mrb[28].mxu0 %v1721_v46  ;;  %775 = vmatmul.mubr.bf16.gmra.mrb[28].mxu1 %v1722_v47 }
 0x14f   : > { %v1468_v48 = vpop.f32.mrb[0].mxu0  ;;  %v1516_v49 = vpop.f32.mrb[0].mxu1 }
 0x150   : > { %v1469_v50 = vpop.f32.mrb[1].mxu0  ;;  %v1517_v52 = vpop.f32.mrb[1].mxu1 }
 0x151   : > { %v1470_v53 = vadd.f32 %v1469_v50, %v1468_v48  ;;  %v1518_v54 = vadd.f32 %v1517_v52, %v1516_v49  ;;  %v1471_v55 = vpop.f32.mrb[2].mxu0  ;;  %v1519_v56 = vpop.f32.mrb[2].mxu1 }
 0x152   : > { %v1472_v57 = vpop.f32.mrb[3].mxu0  ;;  %v1520_v58 = vpop.f32.mrb[3].mxu1 }
 0x153   : > { %v889_v59 = vadd.f32 %v1470_v53, %v2098_v51  ;;  %v905_v60 = vadd.f32 %v1518_v54, %v2098_v51  ;;  %v1473_v61 = vadd.f32 %v1472_v57, %v1471_v55  ;;  %v1521_v62 = vadd.f32 %v1520_v58, %v1519_v56 }
 0x155   : > { %v890_v63 = vadd.f32 %v1473_v61, %v2098_v51  ;;  %v906_v0 = vadd.f32 %v1521_v62, %v2098_v51  ;;  %v921_v1 = vmax.f32 %v889_v59, 0.0  ;;  %v937_v2 = vmax.f32 %v905_v60, 0.0 }
 0x157   : > { %v922_v3 = vmax.f32 %v890_v63, 0.0  ;;  %v938_v4 = vmax.f32 %v906_v0, 0.0  ;;  %v1474_v5 = vpop.f32.mrb[4].mxu0  ;;  %v1522_v6 = vpop.f32.mrb[4].mxu1 }
 0x158   : > { %v1475_v7 = vpop.f32.mrb[5].mxu0  ;;  %v1523_v8 = vpop.f32.mrb[5].mxu1 }
 0x159   : > { %v1360_v9 = vpack.c.bf16 %v922_v3, %v921_v1  ;;  %v1400_v10 = vpack.c.bf16 %v938_v4, %v937_v2  ;;  %v1476_v11 = vadd.f32 %v1475_v7, %v1474_v5  ;;  %v1524_v12 = vadd.f32 %v1523_v8, %v1522_v6  ;;  %v1477_v13 = vpop.f32.mrb[6].mxu0  ;;  %v1525_v14 = vpop.f32.mrb[6].mxu1 }
 0x15a   : > { %v1478_v15 = vpop.f32.mrb[7].mxu0  ;;  %v1526_v16 = vpop.f32.mrb[7].mxu1 }
 0x15b   : > { %1361 = vst [vmem:[%s2105_s9] sm:$0xff] %v1360_v9   ;;  %1444 = vst [vmem:[%s2105_s9 + $0x40] sm:$0xff] %v1400_v10   ;;  %v891_v17 = vadd.f32 %v1476_v11, %v2098_v51  ;;  %v907_v18 = vadd.f32 %v1524_v12, %v2098_v51  ;;  %v1479_v19 = vadd.f32 %v1478_v15, %v1477_v13 }
 0x15c   : > { %v1527_v20 = vadd.f32 %v1526_v16, %v1525_v14 }
 0x15d   : > { %v892_v21 = vadd.f32 %v1479_v19, %v2098_v51  ;;  %v923_v23 = vmax.f32 %v891_v17, 0.0  ;;  %v939_v24 = vmax.f32 %v907_v18, 0.0 }
 0x15e   : > { %v908_v22 = vadd.f32 %v1527_v20, %v2098_v51 }
 0x15f   : > { %v924_v25 = vmax.f32 %v892_v21, 0.0  ;;  %v1480_v27 = vpop.f32.mrb[8].mxu0  ;;  %v1528_v28 = vpop.f32.mrb[8].mxu1 }
 0x160   : > { %v940_v26 = vmax.f32 %v908_v22, 0.0  ;;  %v1481_v29 = vpop.f32.mrb[9].mxu0  ;;  %v1529_v30 = vpop.f32.mrb[9].mxu1 }
 0x161   : > { %v1365_v31 = vpack.c.bf16 %v924_v25, %v923_v23  ;;  %v1482_v33 = vadd.f32 %v1481_v29, %v1480_v27  ;;  %v1530_v34 = vadd.f32 %v1529_v30, %v1528_v28  ;;  %v1483_v35 = vpop.f32.mrb[10].mxu0  ;;  %v1531_v36 = vpop.f32.mrb[10].mxu1 }
 0x162   : > { %v1405_v32 = vpack.c.bf16 %v940_v26, %v939_v24  ;;  %v1484_v37 = vpop.f32.mrb[11].mxu0  ;;  %v1532_v38 = vpop.f32.mrb[11].mxu1 }
 0x163   : > { %1437 = vst [vmem:[%s2105_s9 + $0x8] sm:$0xff] %v1365_v31   ;;  %v893_v39 = vadd.f32 %v1482_v33, %v2098_v51  ;;  %v909_v40 = vadd.f32 %v1530_v34, %v2098_v51  ;;  %v1485_v41 = vadd.f32 %v1484_v37, %v1483_v35  ;;  %v1533_v42 = vadd.f32 %v1532_v38, %v1531_v36 }
 0x164   : > { %1445 = vst [vmem:[%s2105_s9 + $0x48] sm:$0xff] %v1405_v32  }
 0x165   : > { %v894_v43 = vadd.f32 %v1485_v41, %v2098_v51  ;;  %v910_v44 = vadd.f32 %v1533_v42, %v2098_v51  ;;  %v925_v45 = vmax.f32 %v893_v39, 0.0  ;;  %v941_v46 = vmax.f32 %v909_v40, 0.0 }
 0x167   : > { %v926_v47 = vmax.f32 %v894_v43, 0.0  ;;  %v942_v48 = vmax.f32 %v910_v44, 0.0  ;;  %v1486_v49 = vpop.f32.mrb[12].mxu0  ;;  %v1534_v50 = vpop.f32.mrb[12].mxu1 }
 0x168   : > { %v1487_v52 = vpop.f32.mrb[13].mxu0  ;;  %v1535_v53 = vpop.f32.mrb[13].mxu1 }
 0x169   : > { %v1370_v54 = vpack.c.bf16 %v926_v47, %v925_v45  ;;  %v1410_v55 = vpack.c.bf16 %v942_v48, %v941_v46  ;;  %v1488_v56 = vadd.f32 %v1487_v52, %v1486_v49  ;;  %v1536_v57 = vadd.f32 %v1535_v53, %v1534_v50  ;;  %v1489_v58 = vpop.f32.mrb[14].mxu0  ;;  %v1537_v59 = vpop.f32.mrb[14].mxu1 }
 0x16a   : > { %v1490_v60 = vpop.f32.mrb[15].mxu0  ;;  %v1538_v61 = vpop.f32.mrb[15].mxu1 }
 0x16b   : > { %1438 = vst [vmem:[%s2105_s9 + $0x10] sm:$0xff] %v1370_v54   ;;  %1446 = vst [vmem:[%s2105_s9 + $0x50] sm:$0xff] %v1410_v55   ;;  %v895_v62 = vadd.f32 %v1488_v56, %v2098_v51  ;;  %v911_v63 = vadd.f32 %v1536_v57, %v2098_v51  ;;  %v1491_v0 = vadd.f32 %v1490_v60, %v1489_v58 }
 0x16c   : > { %v1539_v1 = vadd.f32 %v1538_v61, %v1537_v59 }
 0x16d   : > { %v896_v2 = vadd.f32 %v1491_v0, %v2098_v51  ;;  %v927_v4 = vmax.f32 %v895_v62, 0.0  ;;  %v943_v5 = vmax.f32 %v911_v63, 0.0 }
 0x16e   : > { %v912_v3 = vadd.f32 %v1539_v1, %v2098_v51 }
 0x16f   : > { %v928_v6 = vmax.f32 %v896_v2, 0.0  ;;  %v1492_v8 = vpop.f32.mrb[16].mxu0  ;;  %v1540_v9 = vpop.f32.mrb[16].mxu1 }
 0x170   : > { %v944_v7 = vmax.f32 %v912_v3, 0.0  ;;  %v1493_v10 = vpop.f32.mrb[17].mxu0  ;;  %v1541_v11 = vpop.f32.mrb[17].mxu1 }
 0x171   : > { %v1375_v12 = vpack.c.bf16 %v928_v6, %v927_v4  ;;  %v1494_v14 = vadd.f32 %v1493_v10, %v1492_v8  ;;  %v1542_v15 = vadd.f32 %v1541_v11, %v1540_v9  ;;  %v1495_v16 = vpop.f32.mrb[18].mxu0  ;;  %v1543_v17 = vpop.f32.mrb[18].mxu1 }
 0x172   : > { %v1415_v13 = vpack.c.bf16 %v944_v7, %v943_v5  ;;  %v1496_v18 = vpop.f32.mrb[19].mxu0  ;;  %v1544_v19 = vpop.f32.mrb[19].mxu1 }
 0x173   : > { %1439 = vst [vmem:[%s2105_s9 + $0x18] sm:$0xff] %v1375_v12   ;;  %v897_v20 = vadd.f32 %v1494_v14, %v2098_v51  ;;  %v913_v21 = vadd.f32 %v1542_v15, %v2098_v51  ;;  %v1497_v22 = vadd.f32 %v1496_v18, %v1495_v16  ;;  %v1545_v23 = vadd.f32 %v1544_v19, %v1543_v17 }
 0x174   : > { %1447 = vst [vmem:[%s2105_s9 + $0x58] sm:$0xff] %v1415_v13  }
 0x175   : > { %v898_v24 = vadd.f32 %v1497_v22, %v2098_v51  ;;  %v914_v25 = vadd.f32 %v1545_v23, %v2098_v51  ;;  %v929_v26 = vmax.f32 %v897_v20, 0.0  ;;  %v945_v27 = vmax.f32 %v913_v21, 0.0 }
 0x177   : > { %v930_v28 = vmax.f32 %v898_v24, 0.0  ;;  %v946_v29 = vmax.f32 %v914_v25, 0.0  ;;  %v1498_v30 = vpop.f32.mrb[20].mxu0  ;;  %v1546_v31 = vpop.f32.mrb[20].mxu1 }
 0x178   : > { %v1499_v32 = vpop.f32.mrb[21].mxu0  ;;  %v1547_v33 = vpop.f32.mrb[21].mxu1 }
 0x179   : > { %v1380_v34 = vpack.c.bf16 %v930_v28, %v929_v26  ;;  %v1420_v35 = vpack.c.bf16 %v946_v29, %v945_v27  ;;  %v1500_v36 = vadd.f32 %v1499_v32, %v1498_v30  ;;  %v1548_v37 = vadd.f32 %v1547_v33, %v1546_v31  ;;  %v1501_v38 = vpop.f32.mrb[22].mxu0  ;;  %v1549_v39 = vpop.f32.mrb[22].mxu1 }
 0x17a   : > { %v1502_v40 = vpop.f32.mrb[23].mxu0  ;;  %v1550_v41 = vpop.f32.mrb[23].mxu1 }
 0x17b   : > { %1440 = vst [vmem:[%s2105_s9 + $0x20] sm:$0xff] %v1380_v34   ;;  %1448 = vst [vmem:[%s2105_s9 + $0x60] sm:$0xff] %v1420_v35   ;;  %v899_v42 = vadd.f32 %v1500_v36, %v2098_v51  ;;  %v915_v43 = vadd.f32 %v1548_v37, %v2098_v51  ;;  %v1503_v44 = vadd.f32 %v1502_v40, %v1501_v38 }
 0x17c   : > { %v1551_v45 = vadd.f32 %v1550_v41, %v1549_v39 }
 0x17d   : > { %v900_v46 = vadd.f32 %v1503_v44, %v2098_v51  ;;  %v931_v48 = vmax.f32 %v899_v42, 0.0  ;;  %v947_v49 = vmax.f32 %v915_v43, 0.0 }
 0x17e   : > { %v916_v47 = vadd.f32 %v1551_v45, %v2098_v51 }
 0x17f   : > { %v932_v50 = vmax.f32 %v900_v46, 0.0  ;;  %v1504_v53 = vpop.f32.mrb[24].mxu0  ;;  %v1552_v54 = vpop.f32.mrb[24].mxu1 }
 0x180   : > { %v948_v52 = vmax.f32 %v916_v47, 0.0  ;;  %v1505_v55 = vpop.f32.mrb[25].mxu0  ;;  %v1553_v56 = vpop.f32.mrb[25].mxu1 }
 0x181   : > { %v1385_v57 = vpack.c.bf16 %v932_v50, %v931_v48  ;;  %v1506_v59 = vadd.f32 %v1505_v55, %v1504_v53  ;;  %v1554_v60 = vadd.f32 %v1553_v56, %v1552_v54  ;;  %v1507_v61 = vpop.f32.mrb[26].mxu0  ;;  %v1555_v62 = vpop.f32.mrb[26].mxu1 }
 0x182   : > { %v1425_v58 = vpack.c.bf16 %v948_v52, %v947_v49  ;;  %v1508_v63 = vpop.f32.mrb[27].mxu0  ;;  %v1556_v0 = vpop.f32.mrb[27].mxu1 }
 0x183   : > { %1441 = vst [vmem:[%s2105_s9 + $0x28] sm:$0xff] %v1385_v57   ;;  %v901_v1 = vadd.f32 %v1506_v59, %v2098_v51  ;;  %v917_v2 = vadd.f32 %v1554_v60, %v2098_v51  ;;  %v1509_v3 = vadd.f32 %v1508_v63, %v1507_v61  ;;  %v1557_v4 = vadd.f32 %v1556_v0, %v1555_v62 }
 0x184   : > { %1449 = vst [vmem:[%s2105_s9 + $0x68] sm:$0xff] %v1425_v58  }
 0x185   : > { %v902_v5 = vadd.f32 %v1509_v3, %v2098_v51  ;;  %v918_v6 = vadd.f32 %v1557_v4, %v2098_v51  ;;  %v933_v7 = vmax.f32 %v901_v1, 0.0  ;;  %v949_v8 = vmax.f32 %v917_v2, 0.0 }
 0x187   : > { %v934_v9 = vmax.f32 %v902_v5, 0.0  ;;  %v950_v10 = vmax.f32 %v918_v6, 0.0  ;;  %v1510_v11 = vpop.f32.mrb[28].mxu0  ;;  %v1558_v12 = vpop.f32.mrb[28].mxu1 }
 0x188   : > { %v1511_v13 = vpop.f32.mrb[29].mxu0  ;;  %v1559_v14 = vpop.f32.mrb[29].mxu1 }
 0x189   : > { %v1390_v15 = vpack.c.bf16 %v934_v9, %v933_v7  ;;  %v1430_v16 = vpack.c.bf16 %v950_v10, %v949_v8  ;;  %v1512_v17 = vadd.f32 %v1511_v13, %v1510_v11  ;;  %v1560_v18 = vadd.f32 %v1559_v14, %v1558_v12  ;;  %v1513_v19 = vpop.f32.mrb[30].mxu0  ;;  %v1561_v20 = vpop.f32.mrb[30].mxu1 }
 0x18a   : > { %v1514_v21 = vpop.f32.mrb[31].mxu0  ;;  %v1562_v22 = vpop.f32.mrb[31].mxu1 }
 0x18b   : > { %1442 = vst [vmem:[%s2105_s9 + $0x30] sm:$0xff] %v1390_v15   ;;  %1450 = vst [vmem:[%s2105_s9 + $0x70] sm:$0xff] %v1430_v16   ;;  %v903_v23 = vadd.f32 %v1512_v17, %v2098_v51  ;;  %v919_v24 = vadd.f32 %v1560_v18, %v2098_v51  ;;  %v1515_v25 = vadd.f32 %v1514_v21, %v1513_v19 }
 0x18c   : > { %v1563_v26 = vadd.f32 %v1562_v22, %v1561_v20 }
 0x18d   : > { %v904_v27 = vadd.f32 %v1515_v25, %v2098_v51  ;;  %v935_v29 = vmax.f32 %v903_v23, 0.0  ;;  %v951_v30 = vmax.f32 %v919_v24, 0.0 }
 0x18e   : > { %v920_v28 = vadd.f32 %v1563_v26, %v2098_v51 }
 0x18f   : > { %v936_v31 = vmax.f32 %v904_v27, 0.0 }
 0x190   : > { %v952_v32 = vmax.f32 %v920_v28, 0.0 }
 0x191   : > { %v1395_v33 = vpack.c.bf16 %v936_v31, %v935_v29 }
 0x192   : > { %v1435_v34 = vpack.c.bf16 %v952_v32, %v951_v30 }
 0x193   : > { %1443 = vst [vmem:[%s2105_s9 + $0x38] sm:$0xff] %v1395_v33  }
 0x194   : > { %1451 = vst [vmem:[%s2105_s9 + $0x78] sm:$0xff] %v1435_v34  }
 0x195   : > { %1794 = shalt.err (!%p1791_p5)
}
 0x196   : > { %s1795_s29 = scalar_lea.hbm %s2154_s7, 2048  ;;  %s1799_s20 = scalar_lea.hbm %s2209_s3, 16384 }
 0x197   : > { %p1796_p9 = scmp.ne.s32.totalorder %s2154_s7, %s1795_s29  ;;  %p1800_p3 = scmp.lt.u32.totalorder %s2154_s7, %s2209_s3 }
 0x198   : > { %p1801_p7 = scmp.lt.u32.totalorder %s1799_s20, %s1795_s29  ;;  %p1803_p4 = scmp.lt.u32.totalorder %s1795_s29, %s2154_s7 }
 0x199   : > { %p1797_p1 = pnand %p1796_p9, %p1993_p11 }
 0x19a   : > { %p1802_p13 = por %p1801_p7, %p1800_p3 }
 0x19b   : > { %p1798_p2 = pneg %p1797_p1 }
 0x19c   : > { %p1804_p6 = por %p1803_p4, %p1802_p13 }
 0x19e   : > { %p1805_p8 = pnand %p1804_p6, %p1798_p2 }
 0x1a0   : > { %1808 = shalt.err (!%p1805_p8)
}
 0x1a1   : > { %s1876_s9 = smov 64   ;;  %s1877_s10 = smov 4  }
 0x1a2   : > { %1586 = dma.vmem_to_hbm [thread:$0]  (%p1993_p11), %s2156_s11, 2048, %s2154_s7, %s1114_s15, %s1876_s9, %s1876_s9, %s1877_s10  }
 0x1a3 PF: > { %p1603_p12 = scmp.ge.s32.totalorder %s1867_s17, 2  ;;  %s1142_s18 = sand.u32 1, %s1847_s12  }
 0x1a4   : > { %p2227_p10 = scmp.ne.s32.totalorder %s2217_s23, 0  ;;  %s1143_s26 = scalar_lea.sflag [#allocation5], %s1142_s18 }
 0x1a6   : > { %p1597_p0 = pnand %p1603_p12, %p2227_p10 }
 0x1a8   : > { %1842 = dma.done.wait (!%p1597_p0), %s1143_s26, 2048  }
 0x1a9   : > { %1844 = vsyncadd (!%p1597_p0), %s1143_s26, 4294965248  ;;  %s20_s17 = sadd.s32 1, %s1867_s17   ;;  %s2228_s12 = smov %s1851_s13 }
 0x1aa   : > { %p17_p5 = scmp.ge.s32.totalorder %s20_s17, 10   ;;  %s2229_s13 = smov %s1855_s14 }
 0x1ab   : > { %s2230_s14 = smov %s2002_s5  ;;  %s2231_s15 = smov %s1863_s16 }
 0x1ac   : > { %s2232_s16 = smov %s2234_s28  ;;  %19 = sbr.rel (!%p17_p5) target bundleno = 7 (0x7), region = 90 }
 0x1b3   :  { %1148 = vsyncpa [#allocation4], 1 }
 0x1b4   :  { %1150 = vsyncpa [#allocation4 + $0x1], 1 }
 0x1b5   :  { %1151 = vsyncpa [#allocation7], 1 }
 0x1b6   :  { %1152 = vsyncpa [#allocation5], 1 }
 0x1b7   :  { %1154 = vsyncpa [#allocation5 + $0x1], 1 }

</bundles_post_ra>
